<compile_context>
chip_gen: v7x
topology: tpu7x:2x2x1
jax: 0.10.0
libtpu: 0.0.40
codegen_flags: <defaults>
</compile_context>

<pallas_src>
import math
from functools import partial

import jax
import jax.numpy as jnp
from jax.experimental import pallas as pl
from jax.experimental.pallas import tpu as pltpu


def _round_up(x, m):
    return (x + m - 1) // m * m


# ---------------------------------------------------------------------------
# Shared MLP-head body (one (TILE_N, ...) batch tile).
# ---------------------------------------------------------------------------
def _heads(x_ref, w1_ref, b1_ref, w2_ref, b2_ref, wh_ref, bh_ref,
           k_ref, loc_ref, nn_pad):
    mm_dtype = w1_ref.dtype
    x = x_ref[...].astype(mm_dtype)
    h1 = jnp.tanh(jnp.dot(x, w1_ref[...],
                          preferred_element_type=jnp.float32) + b1_ref[...])
    h2 = jnp.tanh(jnp.dot(h1.astype(mm_dtype), w2_ref[...],
                          preferred_element_type=jnp.float32) + b2_ref[...])
    heads = jnp.dot(h2.astype(mm_dtype), wh_ref[...],
                    preferred_element_type=jnp.float32) + bh_ref[...]
    full_theta = heads[:, :nn_pad]          # lane-aligned static split
    full_p = heads[:, nn_pad:]
    theta = jnp.exp(full_theta)             # [T, Nn_pad]
    p = jax.nn.sigmoid(full_p)              # [T, Nn_pad]
    rate = (theta * k_ref[...] + loc_ref[...]) * p
    return theta, p, rate


# ---------------------------------------------------------------------------
# Inference kernel: theta, p, rate only.
# ---------------------------------------------------------------------------
def _zig_infer_kernel(x_ref, w1_ref, b1_ref, w2_ref, b2_ref, wh_ref, bh_ref,
                      k_ref, loc_ref,
                      theta_ref, p_ref, rate_ref, *, nn_pad):
    theta, p, rate = _heads(x_ref, w1_ref, b1_ref, w2_ref, b2_ref,
                            wh_ref, bh_ref, k_ref, loc_ref, nn_pad)
    theta_ref[...] = theta
    p_ref[...] = p
    rate_ref[...] = rate


# ---------------------------------------------------------------------------
# Training kernel: forward + fused masked ZIG log-likelihood (per-tile
# partial sums, reduced in the wrapper).
# ---------------------------------------------------------------------------
def _zig_train_kernel(n_rows_ref,                      # scalar prefetch (SMEM)
                      x_ref, y_ref,
                      w1_ref, b1_ref, w2_ref, b2_ref, wh_ref, bh_ref,
                      k_ref, loc_ref, lgk_ref, colv_ref,
                      theta_ref, p_ref, rate_ref, loss_ref,
                      *, nn_pad, tile_n):
    theta, p, rate = _heads(x_ref, w1_ref, b1_ref, w2_ref, b2_ref,
                            wh_ref, bh_ref, k_ref, loc_ref, nn_pad)
    theta_ref[...] = theta
    p_ref[...] = p
    rate_ref[...] = rate

    y = y_ref[...]
    k = k_ref[...]                                      # [1, Nn_pad]
    loc = loc_ref[...]                                  # [1, Nn_pad]
    lgk = lgk_ref[...]                                  # [1, Nn_pad] = lgamma(k)

    eps = 1e-06
    mask = y != 0.0

    # validity: real batch rows (handles N % TILE_N padding) and real neurons
    row_ids = (pl.program_id(0) * tile_n
               + jax.lax.broadcasted_iota(jnp.int32, (tile_n, 1), 0))
    row_valid = row_ids < n_rows_ref[0]
    valid = jnp.logical_and(row_valid, colv_ref[...] > 0.5)

    p_adj = p * (1.0 - 2e-06) + 1e-06
    r_adj = theta + eps
    delta = jnp.maximum(y - loc, eps)

    term_masked = (jnp.log(p_adj)
                   - k * jnp.log(r_adj)
                   - (y - loc) / r_adj
                   - lgk
                   + (k - 1.0) * jnp.log(delta))
    term_unmasked = jnp.log(1.0 - p + eps)

    contrib = (jnp.where(jnp.logical_and(valid, mask), term_masked, 0.0)
               + jnp.where(jnp.logical_and(valid, jnp.logical_not(mask)),
                           term_unmasked, 0.0))

    # per-tile partial sum, kept lane-dense: reduce only over rows, write the
    # (1, Nn_pad) partial into sublane 0 of an (8, Nn_pad) output block.
    partial_row = jnp.sum(contrib, axis=0, keepdims=True)
    sub = jax.lax.broadcasted_iota(jnp.int32, (8, nn_pad), 0)
    loss_ref[...] = jnp.where(sub == 0, partial_row, 0.0)


# ---------------------------------------------------------------------------
# Parameter packing: pad to lane-dense shapes, fuse the two heads, hoist
# parameter-only quantities (k, lgamma(k)) out of the kernel.
# ---------------------------------------------------------------------------
def _pack_params(params, mm_dtype):
    e, g = params["w1"].shape
    nn = params["wt"].shape[1]
    e_pad = _round_up(e, 128)
    g_pad = _round_up(g, 128)
    nn_pad = _round_up(nn, 128)

    def pad2(a, r, c):
        return jnp.pad(a, ((0, r - a.shape[0]), (0, c - a.shape[1])))

    w1 = pad2(params["w1"], e_pad, g_pad).astype(mm_dtype)
    w2 = pad2(params["w2"], g_pad, g_pad).astype(mm_dtype)
    wt = pad2(params["wt"], g_pad, nn_pad)
    wp = pad2(params["wp"], g_pad, nn_pad)
    wh = jnp.concatenate([wt, wp], axis=1).astype(mm_dtype)   # fused head

    b1 = pad2(params["b1"], 1, g_pad)
    b2 = pad2(params["b2"], 1, g_pad)
    bt = pad2(params["bt"], 1, nn_pad)
    bp = pad2(params["bp"], 1, nn_pad)
    bh = jnp.concatenate([bt, bp], axis=1)

    logk = pad2(params["logk"], 1, nn_pad)
    loc = pad2(params["loc"], 1, nn_pad)
    k_row = jnp.exp(logk) + 1e-07
    lgk = jax.lax.lgamma(k_row)             # parameter-only; done in the wrapper
    colv = pad2(jnp.ones((1, nn), jnp.float32), 1, nn_pad)

    return dict(w1=w1, b1=b1, w2=w2, b2=b2, wh=wh, bh=bh,
                k_row=k_row, loc=loc, lgk=lgk, colv=colv,
                dims=(e, g, nn, e_pad, g_pad, nn_pad))


# ---------------------------------------------------------------------------
# Wrapper (matches ZIGRegression.forward semantics and return ordering).
# ---------------------------------------------------------------------------
def zig_forward(params, X, Y=None, *, tile_n=512, mm_dtype=jnp.bfloat16):
    pk = _pack_params(params, mm_dtype)
    e, g, nn, e_pad, g_pad, nn_pad = pk["dims"]
    n = X.shape[0]
    itemsize = jnp.dtype(mm_dtype).itemsize

    # --- choose batch tile: multiple of the sublane pack for mm_dtype, and
    # --- small enough that the double-buffered streamed tiles stay well under
    # --- the 32 MiB scoped VMEM we request (safe on v5e/v6e/v7x).
    align = 8 * max(1, 4 // itemsize)
    tile = max(align, min(_round_up(tile_n, align), _round_up(n, align)))

    def _tile_bytes(t):
        x_b = t * e_pad * itemsize
        y_b = t * nn_pad * 4 if Y is not None else 0
        o_b = 3 * t * nn_pad * 4
        return 2 * (x_b + y_b + o_b)            # x2 for double buffering

    while tile > align and _tile_bytes(tile) > 24 * 1024 * 1024:
        tile = _round_up(tile // 2, align)
    tile_n = tile

    n_tiles = (n + tile_n - 1) // tile_n
    n_pad = n_tiles * tile_n

    x_p = jnp.pad(X.astype(jnp.float32),
                  ((0, n_pad - n), (0, e_pad - e))).astype(mm_dtype)

    # --- BlockSpecs -------------------------------------------------------
    def const_spec(shape, prefetch):
        if prefetch:
            return pl.BlockSpec(shape, lambda i, nref: (0, 0))
        return pl.BlockSpec(shape, lambda i: (0, 0))

    def row_spec(cols, prefetch):
        if prefetch:
            return pl.BlockSpec((tile_n, cols), lambda i, nref: (i, 0))
        return pl.BlockSpec((tile_n, cols), lambda i: (i, 0))

    # --- cost estimate / compiler params -----------------------------------
    flops = 2 * n_pad * (e_pad * g_pad + g_pad * g_pad + g_pad * 2 * nn_pad)
    transc = n_pad * (2 * g_pad + (5 if Y is not None else 2) * nn_pad)
    bytes_accessed = (n_pad * e_pad * itemsize
                      + (n_pad * nn_pad * 4 if Y is not None else 0)
                      + (e_pad * g_pad + g_pad * g_pad + g_pad * 2 * nn_pad) * itemsize
                      + 3 * n_pad * nn_pad * 4)
    cost = pl.CostEstimate(flops=flops, transcendentals=transc,
                           bytes_accessed=bytes_accessed)
    cparams = pltpu.CompilerParams(dimension_semantics=("parallel",),
                                   vmem_limit_bytes=32 * 1024 * 1024)

    k_vec = pk["k_row"][0, :nn]
    loc_vec = params["loc"].reshape(-1)[:nn]

    if Y is None:
        grid_spec = pltpu.PrefetchScalarGridSpec(
            num_scalar_prefetch=0,
            grid=(n_tiles,),
            in_specs=[
                row_spec(e_pad, False),                    # X
                const_spec((e_pad, g_pad), False),         # w1
                const_spec((1, g_pad), False),             # b1
                const_spec((g_pad, g_pad), False),         # w2
                const_spec((1, g_pad), False),             # b2
                const_spec((g_pad, 2 * nn_pad), False),    # w_head
                const_spec((1, 2 * nn_pad), False),        # b_head
                const_spec((1, nn_pad), False),            # k
                const_spec((1, nn_pad), False),            # loc
            ],
            out_specs=[row_spec(nn_pad, False)] * 3,
        )
        fwd = pl.pallas_call(
            partial(_zig_infer_kernel, nn_pad=nn_pad),
            grid_spec=grid_spec,
            out_shape=[jax.ShapeDtypeStruct((n_pad, nn_pad), jnp.float32)] * 3,
            compiler_params=cparams,
            cost_estimate=cost,
        )
        theta_p, p_p, rate_p = fwd(x_p, pk["w1"], pk["b1"], pk["w2"], pk["b2"],
                                   pk["wh"], pk["bh"], pk["k_row"], pk["loc"])
        return (theta_p[:n, :nn], k_vec, p_p[:n, :nn], loc_vec,
                rate_p[:n, :nn])

    # -------- training path: fused loss --------
    y_p = jnp.pad(Y.astype(jnp.float32), ((0, n_pad - n), (0, nn_pad - nn)))
    n_rows = jnp.array([n], dtype=jnp.int32)

    grid_spec = pltpu.PrefetchScalarGridSpec(
        num_scalar_prefetch=1,
        grid=(n_tiles,),
        in_specs=[
            row_spec(e_pad, True),                     # X
            row_spec(nn_pad, True),                    # Y
            const_spec((e_pad, g_pad), True),          # w1
            const_spec((1, g_pad), True),              # b1
            const_spec((g_pad, g_pad), True),          # w2
            const_spec((1, g_pad), True),              # b2
            const_spec((g_pad, 2 * nn_pad), True),     # w_head
            const_spec((1, 2 * nn_pad), True),         # b_head
            const_spec((1, nn_pad), True),             # k
            const_spec((1, nn_pad), True),             # loc
            const_spec((1, nn_pad), True),             # lgamma(k)
            const_spec((1, nn_pad), True),             # column-valid mask
        ],
        out_specs=[
            row_spec(nn_pad, True),                    # theta
            row_spec(nn_pad, True),                    # p
            row_spec(nn_pad, True),                    # rate
            pl.BlockSpec((8, nn_pad), lambda i, nref: (i, 0)),  # loss partials
        ],
    )
    fwd = pl.pallas_call(
        partial(_zig_train_kernel, nn_pad=nn_pad, tile_n=tile_n),
        grid_spec=grid_spec,
        out_shape=[
            jax.ShapeDtypeStruct((n_pad, nn_pad), jnp.float32),
            jax.ShapeDtypeStruct((n_pad, nn_pad), jnp.float32),
            jax.ShapeDtypeStruct((n_pad, nn_pad), jnp.float32),
            jax.ShapeDtypeStruct((n_tiles * 8, nn_pad), jnp.float32),
        ],
        compiler_params=cparams,
        cost_estimate=cost,
    )
    theta_p, p_p, rate_p, loss_part = fwd(
        n_rows, x_p, y_p, pk["w1"], pk["b1"], pk["w2"], pk["b2"],
        pk["wh"], pk["bh"], pk["k_row"], pk["loc"], pk["lgk"], pk["colv"])
    loss = jnp.sum(loss_part)
    return (loss, theta_p[:n, :nn], k_vec, p_p[:n, :nn], loc_vec,
            rate_p[:n, :nn])


# ---------------------------------------------------------------------------
# Deterministic parameter construction (matches nn.Module __init__ semantics).
# Weights stored [in, out] = transpose of PyTorch's [out, in].
# ---------------------------------------------------------------------------
def init_params(key, vit_emb_dim, n_neurons, gen_nodes, factor):
    r1 = 1.0 / math.sqrt(vit_emb_dim)
    r2 = 1.0 / math.sqrt(gen_nodes)
    k1, k2, k3, k4 = jax.random.split(key, 4)
    return {
        "w1": jax.random.uniform(k1, (vit_emb_dim, gen_nodes), jnp.float32, -r1, r1),
        "b1": jnp.zeros((1, gen_nodes), jnp.float32),
        "w2": jax.random.uniform(k2, (gen_nodes, gen_nodes), jnp.float32, -r2, r2),
        "b2": jnp.zeros((1, gen_nodes), jnp.float32),
        "wt": jax.random.uniform(k3, (gen_nodes, n_neurons), jnp.float32, -r2, r2),
        "bt": jnp.zeros((1, n_neurons), jnp.float32),
        "wp": jax.random.uniform(k4, (gen_nodes, n_neurons), jnp.float32, -r2, r2),
        "bp": jnp.zeros((1, n_neurons), jnp.float32),
        "logk": jnp.zeros((1, n_neurons), jnp.float32),
        "loc": jnp.asarray(factor, jnp.float32).reshape(1, n_neurons),
    }


# ---------------------------------------------------------------------------
# Pure-JAX reference (mirrors the PyTorch forward) for validation.
# ---------------------------------------------------------------------------
def zig_reference(params, X, Y):
    hp = jax.lax.Precision.HIGHEST
    h1 = jnp.tanh(jnp.dot(X, params["w1"], precision=hp) + params["b1"])
    h2 = jnp.tanh(jnp.dot(h1, params["w2"], precision=hp) + params["b2"])
    ft = jnp.dot(h2, params["wt"], precision=hp) + params["bt"]
    fp = jnp.dot(h2, params["wp"], precision=hp) + params["bp"]
    theta = jnp.exp(ft)
    p = jax.nn.sigmoid(fp)
    k = jnp.exp(params["logk"]) + 1e-07
    loc = params["loc"]
    rate = (theta * k + loc) * p
    eps = 1e-06
    mask = Y != 0.0
    p_adj = p * (1.0 - 2e-06) + 1e-06
    r_adj = theta + eps
    delta = jnp.maximum(Y - loc, eps)
    tm = (jnp.log(p_adj) - k * jnp.log(r_adj) - (Y - loc) / r_adj
          - jax.lax.lgamma(k) + (k - 1.0) * jnp.log(delta))
    tu = jnp.log(1.0 - p + eps)
    loss = jnp.sum(jnp.where(mask, tm, tu))
    return loss, theta, k[0], p, loc[0], rate


if __name__ == "__main__":
    # Small shapes consistent with the module: X is [Nsamps, ViTEmbDim],
    # outputs are [Nsamps, NNeurons].  N=20 with tile_n=16 exercises the grid
    # (2 tiles) and the padded-row masking in the fused loss.
    N, VIT_EMB, GEN_NODES, N_NEURONS = 20, 32, 32, 16

    key = jax.random.PRNGKey(0)
    kp, kx, ky, km = jax.random.split(key, 4)

    factor = jnp.linspace(0.01, 0.05, N_NEURONS)          # 'loc' buffer
    params = init_params(kp, VIT_EMB, N_NEURONS, GEN_NODES, factor)

    X = jax.random.normal(kx, (N, VIT_EMB), jnp.float32)
    y_vals = jax.random.uniform(ky, (N, N_NEURONS), jnp.float32, 0.1, 2.0)
    y_mask = jax.random.bernoulli(km, 0.6, (N, N_NEURONS))
    Y = jnp.where(y_mask, y_vals, 0.0)

    # Inference mode (Y is None), default bf16 MXU operands.
    theta_i, k_i, p_i, loc_i, rate_i = zig_forward(params, X, tile_n=16)
    jax.block_until_ready((theta_i, k_i, p_i, loc_i, rate_i))
    assert theta_i.shape == (N, N_NEURONS)
    assert p_i.shape == (N, N_NEURONS)
    assert rate_i.shape == (N, N_NEURONS)
    assert k_i.shape == (N_NEURONS,)
    assert loc_i.shape == (N_NEURONS,)

    # Training mode, f32 matmuls for a tight comparison against the reference.
    loss, theta, k, p, loc, rate = zig_forward(params, X, Y, tile_n=16,
                                               mm_dtype=jnp.float32)
    jax.block_until_ready(loss)
    ref_loss, ref_theta, ref_k, ref_p, ref_loc, ref_rate = zig_reference(params, X, Y)

    assert loss.shape == ()
    assert theta.shape == (N, N_NEURONS)
    assert bool(jnp.allclose(theta, ref_theta, rtol=2e-2, atol=2e-2))
    assert bool(jnp.allclose(p, ref_p, rtol=2e-2, atol=2e-2))
    assert bool(jnp.allclose(rate, ref_rate, rtol=2e-2, atol=2e-2))
    assert bool(jnp.allclose(k, ref_k, rtol=1e-5, atol=1e-6))
    assert bool(jnp.allclose(loss, ref_loss, rtol=2e-2, atol=1e-2))

    # Training mode with bf16 MXU operands (fast path on v6e/v7x): just
    # exercise it and check finiteness.
    loss_bf, theta_bf, k_bf, p_bf, loc_bf, rate_bf = zig_forward(
        params, X, Y, tile_n=16)
    jax.block_until_ready(loss_bf)
    assert bool(jnp.isfinite(loss_bf))
    assert bool(jnp.all(jnp.isfinite(rate_bf)))

    print("KERNEL_OK")
</pallas_src>

<mosaic_0001>
module attributes {stable_mosaic.version = 11 : i64} {
  func.func @_zig_infer_kernel(%arg0: i32, %arg1: memref<16x128xbf16, #tpu.memory_space<vmem>>, %arg2: memref<128x128xbf16, #tpu.memory_space<vmem>>, %arg3: memref<1x128xf32, #tpu.memory_space<vmem>>, %arg4: memref<128x128xbf16, #tpu.memory_space<vmem>>, %arg5: memref<1x128xf32, #tpu.memory_space<vmem>>, %arg6: memref<128x256xbf16, #tpu.memory_space<vmem>>, %arg7: memref<1x256xf32, #tpu.memory_space<vmem>>, %arg8: memref<1x128xf32, #tpu.memory_space<vmem>>, %arg9: memref<1x128xf32, #tpu.memory_space<vmem>>, %arg10: memref<16x128xf32, #tpu.memory_space<vmem>>, %arg11: memref<16x128xf32, #tpu.memory_space<vmem>>, %arg12: memref<16x128xf32, #tpu.memory_space<vmem>>) attributes {dimension_semantics = [#tpu.dimension_semantics<parallel>], iteration_bounds = array<i64: 2>, scalar_prefetch = 0 : i64, scratch_operands = 0 : i64, tpu.core_type = #tpu.core_type<tc>, window_params = [{transform_indices = @transform_0, window_bounds = array<i64: 16, 128>}, {pipeline_mode = #tpu.pipeline_mode<synchronous>, transform_indices = @transform_1, window_bounds = array<i64: 128, 128>}, {pipeline_mode = #tpu.pipeline_mode<synchronous>, transform_indices = @transform_2, window_bounds = array<i64: 1, 128>}, {pipeline_mode = #tpu.pipeline_mode<synchronous>, transform_indices = @transform_3, window_bounds = array<i64: 128, 128>}, {pipeline_mode = #tpu.pipeline_mode<synchronous>, transform_indices = @transform_4, window_bounds = array<i64: 1, 128>}, {pipeline_mode = #tpu.pipeline_mode<synchronous>, transform_indices = @transform_5, window_bounds = array<i64: 128, 256>}, {pipeline_mode = #tpu.pipeline_mode<synchronous>, transform_indices = @transform_6, window_bounds = array<i64: 1, 256>}, {pipeline_mode = #tpu.pipeline_mode<synchronous>, transform_indices = @transform_7, window_bounds = array<i64: 1, 128>}, {pipeline_mode = #tpu.pipeline_mode<synchronous>, transform_indices = @transform_8, window_bounds = array<i64: 1, 128>}, {transform_indices = @transform_9, window_bounds = array<i64: 16, 128>}, {transform_indices = @transform_10, window_bounds = array<i64: 16, 128>}, {transform_indices = @transform_11, window_bounds = array<i64: 16, 128>}]} {
    %c0 = arith.constant 0 : index
    %c0_0 = arith.constant 0 : index
    %0 = vector.load %arg1[%c0, %c0_0] : memref<16x128xbf16, #tpu.memory_space<vmem>>, vector<16x128xbf16>
    %c0_1 = arith.constant 0 : index
    %c0_2 = arith.constant 0 : index
    %1 = vector.load %arg2[%c0_1, %c0_2] : memref<128x128xbf16, #tpu.memory_space<vmem>>, vector<128x128xbf16>
    %cst = arith.constant dense<0.000000e+00> : vector<16x128xf32>
    %2 = tpu.matmul %0, %1, %cst {dimension_numbers = #tpu.dot_dimension_numbers<[1], [0], [0], [1], [0, 0, 1, 1], [], []>} : vector<16x128xbf16>, vector<128x128xbf16>, vector<16x128xf32> -> vector<16x128xf32>
    %c0_3 = arith.constant 0 : index
    %c0_4 = arith.constant 0 : index
    %3 = vector.load %arg3[%c0_3, %c0_4] : memref<1x128xf32, #tpu.memory_space<vmem>>, vector<1x128xf32>
    %4 = vector.broadcast %3 : vector<1x128xf32> to vector<16x128xf32>
    %5 = arith.addf %2, %4 : vector<16x128xf32>
    %6 = math.tanh %5 : vector<16x128xf32>
    %7 = arith.truncf %6 : vector<16x128xf32> to vector<16x128xbf16>
    %c0_5 = arith.constant 0 : index
    %c0_6 = arith.constant 0 : index
    %8 = vector.load %arg4[%c0_5, %c0_6] : memref<128x128xbf16, #tpu.memory_space<vmem>>, vector<128x128xbf16>
    %cst_7 = arith.constant dense<0.000000e+00> : vector<16x128xf32>
    %9 = tpu.matmul %7, %8, %cst_7 {dimension_numbers = #tpu.dot_dimension_numbers<[1], [0], [0], [1], [0, 0, 1, 1], [], []>} : vector<16x128xbf16>, vector<128x128xbf16>, vector<16x128xf32> -> vector<16x128xf32>
    %c0_8 = arith.constant 0 : index
    %c0_9 = arith.constant 0 : index
    %10 = vector.load %arg5[%c0_8, %c0_9] : memref<1x128xf32, #tpu.memory_space<vmem>>, vector<1x128xf32>
    %11 = vector.broadcast %10 : vector<1x128xf32> to vector<16x128xf32>
    %12 = arith.addf %9, %11 : vector<16x128xf32>
    %13 = math.tanh %12 : vector<16x128xf32>
    %14 = arith.truncf %13 : vector<16x128xf32> to vector<16x128xbf16>
    %c0_10 = arith.constant 0 : index
    %c0_11 = arith.constant 0 : index
    %15 = vector.load %arg6[%c0_10, %c0_11] : memref<128x256xbf16, #tpu.memory_space<vmem>>, vector<128x256xbf16>
    %cst_12 = arith.constant dense<0.000000e+00> : vector<16x256xf32>
    %16 = tpu.matmul %14, %15, %cst_12 {dimension_numbers = #tpu.dot_dimension_numbers<[1], [0], [0], [1], [0, 0, 1, 1], [], []>} : vector<16x128xbf16>, vector<128x256xbf16>, vector<16x256xf32> -> vector<16x256xf32>
    %c0_13 = arith.constant 0 : index
    %c0_14 = arith.constant 0 : index
    %17 = vector.load %arg7[%c0_13, %c0_14] : memref<1x256xf32, #tpu.memory_space<vmem>>, vector<1x256xf32>
    %18 = vector.broadcast %17 : vector<1x256xf32> to vector<16x256xf32>
    %19 = arith.addf %16, %18 : vector<16x256xf32>
    %20 = vector.extract_strided_slice %19 {offsets = [0, 0], sizes = [16, 128], strides = [1, 1]} : vector<16x256xf32> to vector<16x128xf32>
    %21 = vector.extract_strided_slice %19 {offsets = [0, 128], sizes = [16, 128], strides = [1, 1]} : vector<16x256xf32> to vector<16x128xf32>
    %22 = math.exp %20 : vector<16x128xf32>
    %23 = arith.negf %21 : vector<16x128xf32>
    %24 = math.exp %23 : vector<16x128xf32>
    %cst_15 = arith.constant 1.000000e+00 : f32
    %25 = vector.broadcast %cst_15 : f32 to vector<16x128xf32>
    %26 = arith.addf %25, %24 : vector<16x128xf32>
    %27 = arith.divf %25, %26 : vector<16x128xf32>
    %c0_16 = arith.constant 0 : index
    %c0_17 = arith.constant 0 : index
    %28 = vector.load %arg8[%c0_16, %c0_17] : memref<1x128xf32, #tpu.memory_space<vmem>>, vector<1x128xf32>
    %29 = vector.broadcast %28 : vector<1x128xf32> to vector<16x128xf32>
    %30 = arith.mulf %22, %29 : vector<16x128xf32>
    %c0_18 = arith.constant 0 : index
    %c0_19 = arith.constant 0 : index
    %31 = vector.load %arg9[%c0_18, %c0_19] : memref<1x128xf32, #tpu.memory_space<vmem>>, vector<1x128xf32>
    %32 = vector.broadcast %31 : vector<1x128xf32> to vector<16x128xf32>
    %33 = arith.addf %30, %32 : vector<16x128xf32>
    %34 = arith.mulf %33, %27 : vector<16x128xf32>
    %c0_20 = arith.constant 0 : index
    %c0_21 = arith.constant 0 : index
    %35 = vector.load %arg10[%c0_20, %c0_21] : memref<16x128xf32, #tpu.memory_space<vmem>>, vector<16x128xf32>
    tpu.vector_store %arg10[%c0_20, %c0_21], %22 {strides = array<i32>} : memref<16x128xf32, #tpu.memory_space<vmem>>, vector<16x128xf32>,
    %c0_22 = arith.constant 0 : index
    %c0_23 = arith.constant 0 : index
    %36 = vector.load %arg11[%c0_22, %c0_23] : memref<16x128xf32, #tpu.memory_space<vmem>>, vector<16x128xf32>
    tpu.vector_store %arg11[%c0_22, %c0_23], %27 {strides = array<i32>} : memref<16x128xf32, #tpu.memory_space<vmem>>, vector<16x128xf32>,
    %c0_24 = arith.constant 0 : index
    %c0_25 = arith.constant 0 : index
    %37 = vector.load %arg12[%c0_24, %c0_25] : memref<16x128xf32, #tpu.memory_space<vmem>>, vector<16x128xf32>
    tpu.vector_store %arg12[%c0_24, %c0_25], %34 {strides = array<i32>} : memref<16x128xf32, #tpu.memory_space<vmem>>, vector<16x128xf32>,
    return
  }
  func.func @transform_0(%arg0: i32) -> (i32, i32) {
    %c0_i32 = arith.constant 0 : i32
    %c0_i32_0 = arith.constant 0 : i32
    return %arg0, %c0_i32 : i32, i32
  }
  func.func @transform_1(%arg0: i32) -> (i32, i32) {
    %c0_i32 = arith.constant 0 : i32
    %c0_i32_0 = arith.constant 0 : i32
    %c0_i32_1 = arith.constant 0 : i32
    return %c0_i32, %c0_i32_0 : i32, i32
  }
  func.func @transform_2(%arg0: i32) -> (i32, i32) {
    %c0_i32 = arith.constant 0 : i32
    %c0_i32_0 = arith.constant 0 : i32
    %c0_i32_1 = arith.constant 0 : i32
    return %c0_i32, %c0_i32_0 : i32, i32
  }
  func.func @transform_3(%arg0: i32) -> (i32, i32) {
    %c0_i32 = arith.constant 0 : i32
    %c0_i32_0 = arith.constant 0 : i32
    %c0_i32_1 = arith.constant 0 : i32
    return %c0_i32, %c0_i32_0 : i32, i32
  }
  func.func @transform_4(%arg0: i32) -> (i32, i32) {
    %c0_i32 = arith.constant 0 : i32
    %c0_i32_0 = arith.constant 0 : i32
    %c0_i32_1 = arith.constant 0 : i32
    return %c0_i32, %c0_i32_0 : i32, i32
  }
  func.func @transform_5(%arg0: i32) -> (i32, i32) {
    %c0_i32 = arith.constant 0 : i32
    %c0_i32_0 = arith.constant 0 : i32
    %c0_i32_1 = arith.constant 0 : i32
    return %c0_i32, %c0_i32_0 : i32, i32
  }
  func.func @transform_6(%arg0: i32) -> (i32, i32) {
    %c0_i32 = arith.constant 0 : i32
    %c0_i32_0 = arith.constant 0 : i32
    %c0_i32_1 = arith.constant 0 : i32
    return %c0_i32, %c0_i32_0 : i32, i32
  }
  func.func @transform_7(%arg0: i32) -> (i32, i32) {
    %c0_i32 = arith.constant 0 : i32
    %c0_i32_0 = arith.constant 0 : i32
    %c0_i32_1 = arith.constant 0 : i32
    return %c0_i32, %c0_i32_0 : i32, i32
  }
  func.func @transform_8(%arg0: i32) -> (i32, i32) {
    %c0_i32 = arith.constant 0 : i32
    %c0_i32_0 = arith.constant 0 : i32
    %c0_i32_1 = arith.constant 0 : i32
    return %c0_i32, %c0_i32_0 : i32, i32
  }
  func.func @transform_9(%arg0: i32) -> (i32, i32) {
    %c0_i32 = arith.constant 0 : i32
    %c0_i32_0 = arith.constant 0 : i32
    return %arg0, %c0_i32 : i32, i32
  }
  func.func @transform_10(%arg0: i32) -> (i32, i32) {
    %c0_i32 = arith.constant 0 : i32
    %c0_i32_0 = arith.constant 0 : i32
    return %arg0, %c0_i32 : i32, i32
  }
  func.func @transform_11(%arg0: i32) -> (i32, i32) {
    %c0_i32 = arith.constant 0 : i32
    %c0_i32_0 = arith.constant 0 : i32
    return %arg0, %c0_i32 : i32, i32
  }
}

</mosaic_0001>

<bundles_post_ra>
// kernel: tpu_custom_call.1
= control target key start
LH: loop header
LB: loop body
LE: loop exit
PB: predicated region body
PF: predicated region fallthrough
CT: control target
= control target key end

     0   :  { %s2110_s0 = inlined_call_operand.hbm [shape: bf16[32,128], index: 0, kind: input, shape index: {}]   ;;  %s2111_s1 = inlined_call_operand.hbm [shape: bf16[128,128], index: 1, kind: input, shape index: {}]   ;;  %s2112_s2 = inlined_call_operand.vmem [shape: f32[1,128], index: 2, kind: input, shape index: {}]   ;;  %s2113_s3 = inlined_call_operand.hbm [shape: bf16[128,128], index: 3, kind: input, shape index: {}]   ;;  %s2114_s4 = inlined_call_operand.vmem [shape: f32[1,128], index: 4, kind: input, shape index: {}]   ;;  %s2115_s5 = inlined_call_operand.hbm [shape: bf16[128,256], index: 5, kind: input, shape index: {}]   ;;  %s2116_s6 = inlined_call_operand.vmem [shape: f32[1,256], index: 6, kind: input, shape index: {}]   ;;  %s2117_s7 = inlined_call_operand.vmem [shape: f32[1,128], index: 7, kind: input, shape index: {}]   ;;  %s2118_s8 = inlined_call_operand.vmem [shape: f32[1,128], index: 8, kind: input, shape index: {}]   ;;  %s2119_s9 = inlined_call_operand.hbm [shape: f32[32,128], index: 9, kind: output, shape index: {0}]   ;;  %s2120_s10 = inlined_call_operand.hbm [shape: f32[32,128], index: 10, kind: output, shape index: {1}]   ;;  %s2121_s11 = inlined_call_operand.hbm [shape: f32[32,128], index: 11, kind: output, shape index: {2}]  }
   0x1   :  { %2134 = sst [smem:[#allocation21_spill]] %s2110_s0 }
   0x2   :  { %2135 = sst [smem:[#allocation22_spill]] %s2118_s8 }
   0x3   :  { %2136 = sst [smem:[#allocation23_spill]] %s2120_s10 }
   0x4   :  { %2137 = sst [smem:[#allocation24_spill]] %s2121_s11 }
   0x5   :  { %17 = vsyncpa [#allocation3], 0 }
   0x6   :  { %19 = vsyncpa [#allocation3 + $0x1], 0 }
   0x7   :  { %20 = vsyncpa [#allocation6], 0 }
   0x8   :  { %21 = vsyncpa [#allocation9], 0 }
   0x9   :  { %22 = vsyncpa [#allocation4], 0 }
   0xa   :  { %24 = vsyncpa [#allocation4 + $0x1], 0 }
   0xb   :  { %25 = vsyncpa [#allocation12], 0 }
   0xc   :  { %27 = vsyncpa [#allocation12 + $0x1], 0  ;;  %s1734_s17 = smov 0   ;;  %s1736_s18 = smov 0  }
   0xd   :  { %s1738_s19 = smov 0   ;;  %s1740_s20 = smov 0  }
   0xe LB: > { %2138 = sst [smem:[#allocation19_spill]] %s1644_s17  ;;  %s1755_s21 = sadd.s32 4294967295, %s1656_s20   ;;  %s1656_s20 = sphi %s1740_s20, %s2168_s20   ;;  %s1652_s19 = sphi %s1738_s19, %s2167_s19   ;;  %s1648_s18 = sphi %s1736_s18, %s2166_s18   ;;  %s1644_s17 = sphi %s1734_s17, %s2165_s17  }
   0xf   : > { %s2122_s22 = sadd.s32 4294967294, %s1656_s20   ;;  %p53_p0 = scmp.ne.s32.totalorder %s1648_s18, %s1644_s17 }
  0x10   : > { %p2124_p1 = scmp.eq.s32.totalorder %s1755_s21, 0  ;;  %p251_p3 = scmp.eq.s32.totalorder %s2122_s22, 1 }
  0x11   : > { %p1123_p5 = scmp.ge.s32.totalorder %s1656_s20, 1  ;;  %p310_p7 = scmp.lt.s32.totalorder %s1656_s20, 3 }
  0x12   : > { %p1766_p4 = por %p2124_p1, %p53_p0  ;;  %p1771_p6 = por %p251_p3, %p53_p0 }
  0x13   : > { %p1776_p8 = pnand %p1123_p5, %p310_p7  ;;  %s1658_s26 = smov [#allocation5]  }
  0x14   : > { %s2139_s23 = scalar_select %p1766_p4, 1, 0 }
  0x15   : > { %s2140_s24 = scalar_select %p1771_p6, 1, 0 }
  0x16   : > { %s2142_s25 = scalar_select %p1776_p8, 1, 0 }
  0x17   : > { %2141 = sst [smem:[#allocation20_spill]] %s2140_s24  ;;  %s322_s27 = sshll.u32 %s1658_s26, 4  ;;  %s1780_s27 = int_to_ptr.vmem [resolvable:$true] %s322_s27 }
  0x18   : > { %p1271_p9 = pneg %p1776_p8  ;;  %s1659_s29 = smov [#allocation7]  }
  0x19   : > { %s338_s30 = sshll.u32 %s1659_s29, 4  ;;  %s1660_s12 = smov [#allocation8]   ;;  %s1791_s30 = int_to_ptr.vmem [resolvable:$true] %s338_s30 }
  0x1a   : > { %p1787_p11 = pnand %p1271_p9, %p2124_p1  ;;  %s1793_s13 = sshll.u32 %s1660_s12, 4  ;;  %s355_s13 = int_to_ptr.vmem [resolvable:$true] %s1793_s13 }
  0x1b   : > { %s1408_s16 = scalar_lea.hbm %s2111_s1, 1024 }
  0x1c   : > { %p1409_p12 = scmp.ne.s32.totalorder %s2111_s1, %s1408_s16  ;;  %p1803_p13 = pneg %p1787_p11 }
  0x1d   : > { %p1415_p5 = scmp.lt.u32.totalorder %s1408_s16, %s2111_s1 }
  0x1e   : > { %p1411_p0 = pnand %p1803_p13, %p1409_p12 }
  0x20   : > { %p1412_p3 = pneg %p1411_p0 }
  0x22   : > { %p1417_p7 = pnand %p1415_p5, %p1412_p3 }
  0x24   : > { %1420 = shalt.err (!%p1417_p7)
}
  0x25   : > { %s1421_s22 = scalar_lea.vmem %s1780_s27, 1024  ;;  %p1429_p2 = scmp.lt.s32.totalorder %s1780_s27, %s1780_s27 }
  0x26   : > { %p1422_p9 = scmp.ne.s32.totalorder %s1780_s27, %s1421_s22  ;;  %p1430_p6 = scmp.lt.s32.totalorder %s1421_s22, %s1421_s22 }
  0x28   : > { %p1424_p10 = pnand %p1422_p9, %p1803_p13  ;;  %p1431_p12 = por %p1430_p6, %p1429_p2 }
  0x2a   : > { %p1425_p1 = pneg %p1424_p10 }
  0x2c   : > { %p1432_p0 = pnand %p1431_p12, %p1425_p1 }
  0x2e   : > { %1435 = shalt.err (!%p1432_p0)
}
  0x2f   : > { %s1661_s14 = smov 64   ;;  %s1662_s15 = smov 4  }
  0x30   : > { %1274 = dma.hbm_to_vmem [thread:$0]  (!%p1787_p11), %s2111_s1, 1024, %s1780_s27, [#allocation6], %s1661_s14, %s1661_s14, %s1662_s15  }
  0x31   : > { %s1436_s22 = scalar_lea.hbm %s2113_s3, 1024 }
  0x32   : > { %p1437_p1 = scmp.ne.s32.totalorder %s2113_s3, %s1436_s22  ;;  %p1443_p10 = scmp.lt.u32.totalorder %s1436_s22, %s2113_s3 }
  0x34   : > { %p1439_p2 = pnand %p1437_p1, %p1803_p13 }
  0x36   : > { %p1440_p6 = pneg %p1439_p2 }
  0x38   : > { %p1445_p3 = pnand %p1443_p10, %p1440_p6 }
  0x3a   : > { %1448 = shalt.err (!%p1445_p3)
}
  0x3b   : > { %s1449_s27 = scalar_lea.vmem %s1791_s30, 1024  ;;  %p1457_p12 = scmp.lt.s32.totalorder %s1791_s30, %s1791_s30 }
  0x3c   : > { %p1450_p5 = scmp.ne.s32.totalorder %s1791_s30, %s1449_s27  ;;  %p1458_p0 = scmp.lt.s32.totalorder %s1449_s27, %s1449_s27 }
  0x3e   : > { %p1452_p7 = pnand %p1450_p5, %p1803_p13  ;;  %p1459_p1 = por %p1458_p0, %p1457_p12 }
  0x40   : > { %p1453_p9 = pneg %p1452_p7 }
  0x42   : > { %p1460_p2 = pnand %p1459_p1, %p1453_p9 }
  0x44   : > { %1463 = shalt.err (!%p1460_p2)
}
  0x45   : > { %1277 = dma.hbm_to_vmem [thread:$0]  (!%p1787_p11), %s2113_s3, 1024, %s1791_s30, [#allocation6], %s1661_s14, %s1661_s14, %s1662_s15  }
  0x46   : > { %s1464_s16 = scalar_lea.hbm %s2115_s5, 2048 }
  0x47   : > { %p1465_p6 = scmp.ne.s32.totalorder %s2115_s5, %s1464_s16  ;;  %p1471_p5 = scmp.lt.u32.totalorder %s1464_s16, %s2115_s5 }
  0x49   : > { %p1467_p10 = pnand %p1465_p6, %p1803_p13 }
  0x4b   : > { %p1468_p3 = pneg %p1467_p10 }
  0x4d   : > { %p1473_p7 = pnand %p1471_p5, %p1468_p3 }
  0x4f   : > { %1476 = shalt.err (!%p1473_p7)
}
  0x50   : > { %s1477_s27 = scalar_lea.vmem %s355_s13, 2048  ;;  %p1485_p1 = scmp.lt.s32.totalorder %s355_s13, %s355_s13 }
  0x51   : > { %p1478_p9 = scmp.ne.s32.totalorder %s355_s13, %s1477_s27  ;;  %p1486_p2 = scmp.lt.s32.totalorder %s1477_s27, %s1477_s27 }
  0x53   : > { %p1480_p12 = pnand %p1478_p9, %p1803_p13  ;;  %p1487_p4 = por %p1486_p2, %p1485_p1 }
  0x55   : > { %p1481_p0 = pneg %p1480_p12 }
  0x57   : > { %p1488_p8 = pnand %p1487_p4, %p1481_p0 }
  0x59   : > { %1491 = shalt.err (!%p1488_p8)
}
  0x5a   : > { %s1663_s30 = smov 128   ;;  %s1664_s24 = smov 8  }
  0x5b   : > { %1280 = dma.hbm_to_vmem [thread:$0]  (!%p1787_p11), %s2115_s5, 2048, %s355_s13, [#allocation9], %s1663_s30, %s1663_s30, %s1664_s24  }
  0x5c   : > { %s1873_s11 = sadd.s32 1, %s1656_s20   ;;  %s40_s16 = sadd.s32 1, %s1652_s19 }
  0x5d   : > { %s37_s17 = ssub.s32 %s1656_s20, %s1873_s11  ;;  %p47_p8 = scmp.ne.s32.totalorder %s1652_s19, %s1648_s18 }
  0x5e   : > { %p38_p4 = scmp.eq.s32.totalorder %s37_s17, 0  ;;  %p48_p13 = scmp.eq.s32.totalorder %s1656_s20, 0 }
  0x5f   : > { %p1298_p6 = scmp.lt.s32.totalorder %s1656_s20, 2  ;;  %p2145_p3 = scmp.eq.s32.totalorder %s1755_s21, 1 }
  0x60   : > { %s1883_s26 = scalar_select %p38_p4, %s1652_s19, %s40_s16  }
  0x61   : > { %p49_p10 = por %p48_p13, %p47_p8  ;;  %p1887_p5 = por %p2145_p3, %p47_p8 }
  0x62   : > { %s377_s28 = sand.u32 1, %s1652_s19   ;;  %s1189_s12 = sshll.u32 %s1656_s20, 7 }
  0x63   : > { %s1128_s13 = sshll.u32 %s377_s28, 3  ;;  %s2147_s0 = sld [smem:[#allocation21_spill]] }
  0x64   : > { %s381_s24 = scalar_lea.vmem [#allocation2], %s1128_s13  ;;  %p1898_p11 = pnand %p1298_p6, %p49_p10 }
  0x65   : > { %s388_s8 = sshll.u32 %s381_s24, 4  ;;  %s1904_s17 = scalar_lea.sflag [#allocation3], %s377_s28  ;;  %s1902_s8 = int_to_ptr.vmem [resolvable:$true] %s388_s8 }
  0x66   : > { %p1494_p9 = pneg %p1898_p11 }
  0x69   : > { %s1896_s30 = scalar_lea.hbm %s2147_s0, %s1189_s12  ;;  %s1497_s22 = scalar_lea.hbm %s2147_s0, 256 }
  0x6a   : > { %s1492_s16 = scalar_lea.hbm %s1896_s30, 128  ;;  %p1498_p1 = scmp.lt.u32.totalorder %s1896_s30, %s2147_s0 }
  0x6b   : > { %p1493_p7 = scmp.ne.s32.totalorder %s1896_s30, %s1492_s16  ;;  %p1499_p2 = scmp.lt.u32.totalorder %s1497_s22, %s1492_s16 }
  0x6c   : > { %p1501_p8 = scmp.lt.u32.totalorder %s1492_s16, %s1896_s30 }
  0x6d   : > { %p1495_p12 = pnand %p1494_p9, %p1493_p7  ;;  %p1500_p4 = por %p1499_p2, %p1498_p1 }
  0x6f   : > { %p1496_p0 = pneg %p1495_p12  ;;  %p1502_p13 = por %p1501_p8, %p1500_p4 }
  0x71   : > { %p1503_p6 = pnand %p1502_p13, %p1496_p0 }
  0x73   : > { %1506 = shalt.err (!%p1503_p6)
}
  0x74   : > { %s1507_s28 = scalar_lea.vmem %s1902_s8, 128  ;;  %s1665_s12 = smov [#allocation2]  }
  0x75   : > { %p1508_p10 = scmp.ne.s32.totalorder %s1902_s8, %s1507_s28  ;;  %s1512_s13 = sshll.u32 %s1665_s12, 4  ;;  %s1513_s13 = int_to_ptr.vmem [resolvable:$false] %s1512_s13 }
  0x76   : > { %s1514_s27 = scalar_lea.vmem %s1513_s13, 256  ;;  %p1515_p12 = scmp.lt.s32.totalorder %s1902_s8, %s1513_s13 }
  0x77   : > { %p1510_p3 = pnand %p1508_p10, %p1494_p9  ;;  %p1516_p1 = scmp.lt.s32.totalorder %s1514_s27, %s1507_s28 }
  0x79   : > { %p1511_p7 = pneg %p1510_p3  ;;  %p1517_p2 = por %p1516_p1, %p1515_p12 }
  0x7b   : > { %p1518_p4 = pnand %p1517_p2, %p1511_p7 }
  0x7d   : > { %1521 = shalt.err (!%p1518_p4)
}
  0x7e   : > { %1284 = dma.hbm_to_vmem [thread:$0]  (!%p1898_p11), %s1896_s30, 128, %s1902_s8, %s1904_s17, %s1661_s14, %s1661_s14, %s1662_s15  }
  0x7f   : > { %p2149_p9 = scmp.ne.s32.totalorder %s2142_s25, 0 }
  0x80   : > { %s1938_s16 = sand.u32 (!%p2149_p9), 1, %s1648_s18   ;;  %p2150_p0 = scmp.ne.s32.totalorder (!%p2149_p9), %s2139_s23, 0 }
  0x81   : > { %400 = sbr.rel (%p2149_p9) target bundleno = 931 (0x3a3), region = 56  ;;  %s1132_s22 = sshll.u32 (!%p2149_p9), %s1938_s16, 3 }
  0x82   : > { %s403_s24 = scalar_lea.sflag (!%p2149_p9), [#allocation3], %s1938_s16  ;;  %s1942_s28 = scalar_lea.vmem (!%p2149_p9), [#allocation2], %s1132_s22 }
  0x88   : > { %1623 = dma.done.wait (%p2150_p0), %s403_s24, 128  }
  0x89   : > { %1625 = vsyncadd (%p2150_p0), %s403_s24, 4294967168  ;;  %p2151_p11 = scmp.eq.s32.totalorder %s1755_s21, 0 }
  0x8b   : > { %1627 = dma.done.wait (%p2151_p11), [#allocation6], 2048   ;;  %p2152_p8 = pmov %p2151_p11 }
  0x8d   : > { %1629 = vsyncadd (%p2152_p8), [#allocation6], 4294965248  ;;  %p2153_p13 = pmov %p2152_p8 }
  0x8e   : > { %p2154_p6 = pmov %p2152_p8 }
  0x8f   : > { %1631 = dma.done.wait (%p2153_p13), [#allocation9], 2048  }
  0x90   : > { %1633 = vsyncadd (%p2154_p6), [#allocation9], 4294965248  ;;  %v1666_v0 = vmov 0.0   ;;  %vm1667_vm0 = vmmov 0   ;;  %v1347_v1 = vld [vmem:[#allocation5] sm:$0xff]   ;;  %v1348_v2 = vld [vmem:[#allocation5 + $0x8] sm:$0xff]   ;;  %v728_v55 = vlaneseq }
  0x91   : > { %1211 = vmatprep.subr.bf16.mxu0 %v1666_v0  ;;  %1227 = vmatprep.mubr.msk.bf16.mxu0 %vm1667_vm0, %v1666_v0  ;;  %v1349_v3 = vld [vmem:[#allocation5 + $0x10] sm:$0xff]   ;;  %v1356_v4 = vld [vmem:[#allocation7] sm:$0xff]   ;;  %v1350_v5 = vld [vmem:[#allocation5 + $0x18] sm:$0xff]   ;;  %v1668_v42 = vmov 0   ;;  %s1967_s10 = sshll.u32 %s1938_s16, 4  ;;  %s1970_s17 = sshll.u32 %s1755_s21, 8 }
  0x92   : > { %1231 = vmatprep.subr.bf16.mxu1 %v1666_v0  ;;  %1247 = vmatprep.mubr.msk.bf16.mxu1 %vm1667_vm0, %v1666_v0  ;;  %v1357_v6 = vld [vmem:[#allocation7 + $0x8] sm:$0xff]   ;;  %v1351_v7 = vld [vmem:[#allocation5 + $0x20] sm:$0xff]   ;;  %v1358_v8 = vld [vmem:[#allocation7 + $0x10] sm:$0xff]   ;;  %v729_v56 = vshrl.u32 %v728_v55, 7  ;;  %s452_s12 = scalar_lea.vmem [#allocation10], %s1967_s10  ;;  %s1977_s24 = scalar_lea.hbm %s2119_s9, %s1970_s17 }
  0x93   : > { %1212 = vmatpush3.bf16.msra.mxu0 %v1347_v1  ;;  %1232 = vmatpush3.bf16.msra.mxu1 %v1356_v4  ;;  %v1352_v9 = vld [vmem:[#allocation5 + $0x28] sm:$0xff]   ;;  %v1359_v10 = vld [vmem:[#allocation7 + $0x18] sm:$0xff]   ;;  %v1353_v11 = vld [vmem:[#allocation5 + $0x30] sm:$0xff]   ;;  %s927_s13 = sshll.u32 %s452_s12, 4  ;;  %s1669_s25 = smov [#allocation10]   ;;  %s1979_s13 = int_to_ptr.vmem [resolvable:$true] %s927_s13 }
  0x94   : > { %1213 = vmatprep.subr.bf16.mxu0 %v1666_v0  ;;  %1233 = vmatprep.subr.bf16.mxu1 %v1666_v0  ;;  %v1354_v12 = vld [vmem:[#allocation5 + $0x38] sm:$0xff]   ;;  %v1360_v14 = vld [vmem:[#allocation7 + $0x20] sm:$0xff]   ;;  %v1361_v15 = vld [vmem:[#allocation7 + $0x28] sm:$0xff]   ;;  %v730_v57 = vsub.s32 0, %v729_v56  ;;  %v734_v59 = vsub.s32 1, %v729_v56  ;;  %s1522_s23 = scalar_lea.vmem %s1979_s13, 256 }
  0x95   : > { %v1355_v13 = vld [vmem:[%s1942_s28] sm:$0xff]   ;;  %v1364_v18 = vld [vmem:[#allocation8] ss:$8 sps:$4 sm:$0xff]   ;;  %v1366_v19 = vld [vmem:[#allocation8 + $0x4] ss:$8 sps:$4 sm:$0xff]   ;;  %s904_s28 = scalar_lea.sflag [#allocation4], %s1938_s16  ;;  %p1523_p10 = scmp.ne.s32.totalorder %s1979_s13, %s1522_s23 }
  0x96   : > { %v1362_v16 = vld [vmem:[#allocation7 + $0x30] sm:$0xff]   ;;  %v1363_v17 = vld [vmem:[#allocation7 + $0x38] sm:$0xff]   ;;  %v1372_v22 = vld [vmem:[#allocation8 + $0x24] ss:$8 sps:$4 sm:$0xff]   ;;  %s1526_s14 = sshll.u32 %s1669_s25, 4  ;;  %s1527_s14 = int_to_ptr.vmem [resolvable:$false] %s1526_s14 }
  0x97   : > { %1214 = vmatpush3.bf16.msra.mxu0 %v1348_v2  ;;  %1234 = vmatpush3.bf16.msra.mxu1 %v1357_v6  ;;  %v1369_v20 = vld [vmem:[#allocation8 + $0x14] ss:$8 sps:$4 sm:$0xff]   ;;  %v1367_v21 = vld [vmem:[#allocation8 + $0x10] ss:$8 sps:$4 sm:$0xff]   ;;  %v1370_v23 = vld [vmem:[#allocation8 + $0x20] ss:$8 sps:$4 sm:$0xff]   ;;  %p1524_p3 = pnand %p1523_p10, %p1887_p5  ;;  %p1529_p12 = scmp.lt.s32.totalorder %s1979_s13, %s1527_s14 }
  0x98   : > { %1215 = vmatprep.subr.bf16.mxu0 %v1666_v0  ;;  %1235 = vmatprep.subr.bf16.mxu1 %v1666_v0  ;;  %v1375_v24 = vld [vmem:[#allocation8 + $0x34] ss:$8 sps:$4 sm:$0xff]   ;;  %v1373_v25 = vld [vmem:[#allocation8 + $0x30] ss:$8 sps:$4 sm:$0xff]   ;;  %v1378_v36 = vld [vmem:[#allocation8 + $0x44] ss:$8 sps:$4 sm:$0xff]  }
  0x99   : > { %v1139_v26 = vld [vmem:[%s2112_s2] ss:$0 sm:$0xff]  ;;  %v1376_v37 = vld [vmem:[#allocation8 + $0x40] ss:$8 sps:$4 sm:$0xff]   ;;  %v1381_v38 = vld [vmem:[#allocation8 + $0x54] ss:$8 sps:$4 sm:$0xff]   ;;  %p1525_p7 = pneg %p1524_p3 }
  0x9a   : > { %v1379_v39 = vld [vmem:[#allocation8 + $0x50] ss:$8 sps:$4 sm:$0xff]   ;;  %v1384_v40 = vld [vmem:[#allocation8 + $0x64] ss:$8 sps:$4 sm:$0xff]   ;;  %v1382_v41 = vld [vmem:[#allocation8 + $0x60] ss:$8 sps:$4 sm:$0xff]  }
  0x9b   : > { %1216 = vmatpush3.bf16.msra.mxu0 %v1349_v3  ;;  %1236 = vmatpush3.bf16.msra.mxu1 %v1358_v8  ;;  %v1387_v43 = vld [vmem:[#allocation8 + $0x74] ss:$8 sps:$4 sm:$0xff]   ;;  %v1385_v44 = vld [vmem:[#allocation8 + $0x70] ss:$8 sps:$4 sm:$0xff]   ;;  %s1528_s15 = scalar_lea.vmem %s1527_s14, 512 }
  0x9c   : > { %1217 = vmatprep.subr.bf16.mxu0 %v1666_v0  ;;  %1237 = vmatprep.subr.bf16.mxu1 %v1666_v0  ;;  %v1149_v45 = vld [vmem:[%s2114_s4] ss:$0 sm:$0xff]  ;;  %p1530_p1 = scmp.lt.s32.totalorder %s1528_s15, %s1522_s23 }
  0x9d   : > { %v726_v58 = vld [vmem:[%s2116_s6] sm:$0x3] }
  0x9e   : > { %v731_v60 = vrot.slane %v726_v58, %v730_v57  ;;  %v735_v61 = vrot.slane %v726_v58, %v734_v59  ;;  %p1531_p2 = por %p1530_p1, %p1529_p12 }
  0x9f   : > { %1218 = vmatpush3.bf16.msra.mxu0 %v1350_v5  ;;  %1238 = vmatpush3.bf16.msra.mxu1 %v1359_v10 }
  0xa0   : > { %1219 = vmatprep.subr.bf16.mxu0 %v1666_v0  ;;  %1239 = vmatprep.subr.bf16.mxu1 %v1666_v0  ;;  %p1532_p4 = pnand %p1531_p2, %p1525_p7 }
  0xa3   : > { %1220 = vmatpush3.bf16.msra.mxu0 %v1351_v7  ;;  %1240 = vmatpush3.bf16.msra.mxu1 %v1360_v14 }
  0xa4   : > { %1221 = vmatprep.subr.bf16.mxu0 %v1666_v0  ;;  %1241 = vmatprep.subr.bf16.mxu1 %v1666_v0 }
  0xa7   : > { %1222 = vmatpush3.bf16.msra.mxu0 %v1352_v9  ;;  %1242 = vmatpush3.bf16.msra.mxu1 %v1361_v15 }
  0xa8   : > { %1223 = vmatprep.subr.bf16.mxu0 %v1666_v0  ;;  %1243 = vmatprep.subr.bf16.mxu1 %v1666_v0 }
  0xab   : > { %1224 = vmatpush3.bf16.msra.mxu0 %v1353_v11  ;;  %1244 = vmatpush3.bf16.msra.mxu1 %v1362_v16 }
  0xac   : > { %1225 = vmatprep.subr.bf16.mxu0 %v1666_v0  ;;  %1245 = vmatprep.subr.bf16.mxu1 %v1666_v0 }
  0xaf   : > { %1226 = vmatpush3.bf16.msra.mxu0 %v1354_v12  ;;  %1246 = vmatpush3.bf16.msra.mxu1 %v1363_v17 }
  0xb0   : > { %818 = vmatprep.subr.bf16.mxu0 %v1366_v19 }
  0xb2   : > { %1228 = vmatmul.mubr.bf16.vlgmr.msra.gmra.mrb[0].mxu0 %v1355_v13 }
  0xb3   : > { %819 = vmatpush1.bf16.msra.mxu0 %v1364_v18  ;;  %850 = vmatprep.mubr.bf16.mxu0 %v1668_v42 }
  0xb4   : > { %820 = vmatprep.subr.bf16.mxu0 %v1369_v20 }
  0xb7   : > { %821 = vmatpush1.bf16.msra.mxu0 %v1367_v21 }
  0xb8   : > { %822 = vmatprep.subr.bf16.mxu0 %v1372_v22 }
  0xbb   : > { %823 = vmatpush1.bf16.msra.mxu0 %v1370_v23 }
  0xbc   : > { %824 = vmatprep.subr.bf16.mxu0 %v1375_v24 }
  0xbf   : > { %825 = vmatpush1.bf16.msra.mxu0 %v1373_v25 }
  0xc0   : > { %826 = vmatprep.subr.bf16.mxu0 %v1378_v36 }
  0xc3   : > { %827 = vmatpush1.bf16.msra.mxu0 %v1376_v37 }
  0xc4   : > { %828 = vmatprep.subr.bf16.mxu0 %v1381_v38 }
  0xc7   : > { %829 = vmatpush1.bf16.msra.mxu0 %v1379_v39 }
  0xc8   : > { %830 = vmatprep.subr.bf16.mxu0 %v1384_v40 }
  0xcb   : > { %831 = vmatpush1.bf16.msra.mxu0 %v1382_v41 }
  0xcc   : > { %832 = vmatprep.subr.bf16.mxu0 %v1387_v43 }
  0xcf   : > { %833 = vmatpush1.bf16.msra.mxu0 %v1385_v44 }
 0x185   : > { %v585_v27 = vpop.f32.mrb[0].mxu0 }
 0x186   : > { %v586_v28 = vadd.f32 %v1139_v26, %v585_v27  ;;  %v1229_v29 = vpop.f32.mrb[1].mxu0 }
 0x187   : > { %v588_v30 = vpop.f32.mrb[2].mxu0 }
 0x188   : > { %v589_v31 = vadd.f32 %v1139_v26, %v588_v30  ;;  %v1230_v32 = vpop.f32.mrb[3].mxu0  ;;  %1388 = vtanh.f32 %v586_v28 }
 0x18a   : > { %1390 = vtanh.f32 %v589_v31 }
 0x192   : > { %v1389_v33 = vpop.eup %1388 }
 0x194   : > { %v1391_v34 = vpop.eup %1390 }
 0x195   : > { %v594_v35 = vpack.c.bf16 %v1391_v34, %v1389_v33 }
 0x197   : > { %1248 = vmatmul.mubr.bf16.vlgmr.msra.gmra.mrb[0].mxu1 %v594_v35 }
 0x26a   : > { %v700_v46 = vpop.f32.mrb[0].mxu1 }
 0x26b   : > { %v701_v47 = vadd.f32 %v1149_v45, %v700_v46  ;;  %v1249_v48 = vpop.f32.mrb[1].mxu1 }
 0x26c   : > { %v703_v49 = vpop.f32.mrb[2].mxu1 }
 0x26d   : > { %v704_v50 = vadd.f32 %v1149_v45, %v703_v49  ;;  %v1250_v51 = vpop.f32.mrb[3].mxu1  ;;  %1392 = vtanh.f32 %v701_v47 }
 0x26f   : > { %1394 = vtanh.f32 %v704_v50 }
 0x277   : > { %v1393_v52 = vpop.eup %1392 }
 0x279   : > { %v1395_v53 = vpop.eup %1394 }
 0x27a   : > { %v709_v54 = vpack.c.bf16 %v1395_v53, %v1393_v52 }
 0x27c   : > { %851 = vmatmul.mubr.bf16.vlgmr.msra.gmra.mrb[4].mxu0 %v709_v54 }
 0x34f   : > { %v852_v62 = vpop.f32.mrb[4].mxu0 }
 0x350   : > { %v853_v63 = vadd.f32 %v852_v62, %v731_v60  ;;  %v854_v0 = vpop.f32.mrb[5].mxu0 }
 0x351   : > { %v855_v1 = vadd.f32 %v854_v0, %v735_v61  ;;  %v856_v2 = vpop.f32.mrb[6].mxu0 }
 0x352   : > { %v861_v3 = vmul.f32 1.442695, %v853_v63  ;;  %v857_v4 = vadd.f32 %v856_v2, %v731_v60  ;;  %v858_v5 = vpop.f32.mrb[7].mxu0 }
 0x353   : > { %v1174_v6 = vmul.f32 -1.442695, %v855_v1  ;;  %v859_v7 = vadd.f32 %v858_v5, %v735_v61 }
 0x354   : > { %1396 = vpow2.f32 %v861_v3  ;;  %v863_v8 = vmul.f32 1.442695, %v857_v4 }
 0x355   : > { %1398 = vpow2.f32 %v1174_v6  ;;  %v1175_v9 = vmul.f32 -1.442695, %v859_v7 }
 0x356   : > { %1400 = vpow2.f32 %v863_v8 }
 0x357   : > { %1402 = vpow2.f32 %v1175_v9 }
 0x35e   : > { %v1397_v10 = vpop.eup %1396 }
 0x35f   : > { %v1399_v11 = vpop.eup %1398  ;;  %897 = vst [vmem:[%s452_s12] sm:$0xff] %v1397_v10 }
 0x360   : > { %v1401_v12 = vpop.eup %1400  ;;  %v871_v13 = vadd.f32 1.0, %v1399_v11 }
 0x361   : > { %v1403_v14 = vpop.eup %1402  ;;  %898 = vst [vmem:[%s452_s12 + $0x8] sm:$0xff] %v1401_v12 }
 0x362   : > { %1404 = vrcp.f32 %v871_v13  ;;  %v872_v15 = vadd.f32 1.0, %v1403_v14 }
 0x363   : > { %1535 = shalt.err (!%p1532_p4)
}
 0x364   : > { %s1536_s30 = scalar_lea.hbm %s1977_s24, 256  ;;  %s1540_s27 = scalar_lea.hbm %s2119_s9, 512 }
 0x365   : > { %p1537_p9 = scmp.ne.s32.totalorder %s1977_s24, %s1536_s30  ;;  %p1541_p8 = scmp.lt.u32.totalorder %s1977_s24, %s2119_s9 }
 0x366   : > { %p1542_p13 = scmp.lt.u32.totalorder %s1540_s27, %s1536_s30  ;;  %p1544_p10 = scmp.lt.u32.totalorder %s1536_s30, %s1977_s24 }
 0x367   : > { %p1538_p0 = pnand %p1537_p9, %p1887_p5 }
 0x368   : > { %p1543_p6 = por %p1542_p13, %p1541_p8 }
 0x369   : > { %p1539_p11 = pneg %p1538_p0 }
 0x36a   : > { %p1545_p3 = por %p1544_p10, %p1543_p6 }
 0x36c   : > { %p1546_p7 = pnand %p1545_p3, %p1539_p11 }
 0x36e   : > { %1549 = shalt.err (!%p1546_p7)
}
 0x36f   : > { %s2130_s23 = smov 128   ;;  %s2132_s14 = smov 8   ;;  %v1176_v16 = vld [vmem:[%s2117_s7] ss:$0 sm:$0xff]  ;;  %1406 = vrcp.f32 %v872_v15  ;;  %v1405_v21 = vpop.eup %1404 }
 0x370   : > { %1265 = dma.vmem_to_hbm [thread:$0]  (%p1887_p5), %s1979_s13, 256, %s1977_s24, %s904_s28, %s2130_s23, %s2130_s23, %s2132_s14   ;;  %v884_v17 = vmul.f32 %v1397_v10, %v1176_v16  ;;  %v885_v19 = vmul.f32 %v1401_v12, %v1176_v16 }
 0x371   : > { %s2155_s27 = sld [smem:[#allocation22_spill]]  ;;  %s908_s22 = sand.u32 1, %s1755_s21  }
 0x372   : > { %s459_s25 = scalar_lea.vmem [#allocation11], %s1967_s10  ;;  %s2017_s16 = scalar_lea.vmem [#allocation13], %s1967_s10 }
 0x373   : > { %s943_s0 = sshll.u32 %s459_s25, 4  ;;  %s959_s13 = sshll.u32 %s2017_s16, 4  ;;  %899 = vst [vmem:[%s459_s25] sm:$0xff] %v1405_v21  ;;  %s2026_s0 = int_to_ptr.vmem [resolvable:$true] %s943_s0  ;;  %s2035_s13 = int_to_ptr.vmem [resolvable:$true] %s959_s13 }
 0x374   : > { %s2156_s15 = sld [smem:[#allocation23_spill]]  ;;  %s2157_s8 = sld [smem:[#allocation24_spill]] }
 0x375   : > { %s1550_s24 = scalar_lea.vmem %s2026_s0, 256  ;;  %s1672_s28 = smov [#allocation11]  }
 0x376   : > { %p1551_p12 = scmp.ne.s32.totalorder %s2026_s0, %s1550_s24  ;;  %s1554_s23 = sshll.u32 %s1672_s28, 4  ;;  %s1555_s23 = int_to_ptr.vmem [resolvable:$false] %s1554_s23 }
 0x377   : > { %v1177_v18 = vld [vmem:[%s2155_s27] ss:$0 sm:$0xff]  ;;  %s2037_s27 = scalar_lea.sflag [#allocation12], %s908_s22  ;;  %s1556_s14 = scalar_lea.vmem %s1555_s23, 512 }
 0x378   : > { %v893_v20 = vadd.f32 %v1177_v18, %v884_v17  ;;  %v894_v23 = vadd.f32 %v1177_v18, %v885_v19  ;;  %p1552_p1 = pnand %p1551_p12, %p1887_p5  ;;  %p1557_p4 = scmp.lt.s32.totalorder %s2026_s0, %s1555_s23 }
 0x379   : > { %v1407_v24 = vpop.eup %1406  ;;  %p1558_p9 = scmp.lt.s32.totalorder %s1556_s14, %s1550_s24 }
 0x37a   : > { %v895_v22 = vmul.f32 %v1405_v21, %v893_v20  ;;  %s2024_s30 = scalar_lea.hbm %s2156_s15, %s1970_s17  ;;  %v896_v25 = vmul.f32 %v1407_v24, %v894_v23  ;;  %900 = vst [vmem:[%s459_s25 + $0x8] sm:$0xff] %v1407_v24  ;;  %s2033_s12 = scalar_lea.hbm %s2157_s8, %s1970_s17 }
 0x37b   : > { %p1553_p2 = pneg %p1552_p1  ;;  %p1559_p0 = por %p1558_p9, %p1557_p4 }
 0x37c   : > { %901 = vst [vmem:[%s2017_s16] sm:$0xff] %v895_v22 }
 0x37d   : > { %p1560_p11 = pnand %p1559_p0, %p1553_p2 }
 0x37f   : > { %1563 = shalt.err (!%p1560_p11)
}
 0x380   : > { %s1564_s17 = scalar_lea.hbm %s2024_s30, 256  ;;  %s1568_s21 = scalar_lea.hbm %s2156_s15, 512 }
 0x381   : > { %p1565_p8 = scmp.ne.s32.totalorder %s2024_s30, %s1564_s17  ;;  %p1569_p10 = scmp.lt.u32.totalorder %s2024_s30, %s2156_s15 }
 0x382   : > { %p1570_p3 = scmp.lt.u32.totalorder %s1568_s21, %s1564_s17  ;;  %p1572_p12 = scmp.lt.u32.totalorder %s1564_s17, %s2024_s30 }
 0x383   : > { %p1566_p13 = pnand %p1565_p8, %p1887_p5 }
 0x384   : > { %p1571_p7 = por %p1570_p3, %p1569_p10 }
 0x385   : > { %p1567_p6 = pneg %p1566_p13 }
 0x386   : > { %p1573_p1 = por %p1572_p12, %p1571_p7 }
 0x388   : > { %p1574_p2 = pnand %p1573_p1, %p1567_p6 }
 0x38a   : > { %1577 = shalt.err (!%p1574_p2)
}
 0x38b   : > { %s2158_s14 = smov 8   ;;  %s2159_s24 = smov 128   ;;  %902 = vst [vmem:[%s2017_s16 + $0x8] sm:$0xff] %v896_v25 }
 0x38c   : > { %1266 = dma.vmem_to_hbm [thread:$0]  (%p1887_p5), %s2026_s0, 256, %s2024_s30, %s2037_s27, %s2159_s24, %s2159_s24, %s2158_s14  }
 0x38d   : > { %s1578_s28 = scalar_lea.vmem %s2035_s13, 256  ;;  %s1673_s17 = smov [#allocation13]  }
 0x38e   : > { %p1579_p4 = scmp.ne.s32.totalorder %s2035_s13, %s1578_s28  ;;  %s1582_s22 = sshll.u32 %s1673_s17, 4  ;;  %s1583_s22 = int_to_ptr.vmem [resolvable:$false] %s1582_s22 }
 0x38f   : > { %s1584_s25 = scalar_lea.vmem %s1583_s22, 512  ;;  %p1585_p11 = scmp.lt.s32.totalorder %s2035_s13, %s1583_s22 }
 0x390   : > { %p1580_p9 = pnand %p1579_p4, %p1887_p5  ;;  %p1586_p8 = scmp.lt.s32.totalorder %s1584_s25, %s1578_s28 }
 0x392   : > { %p1581_p0 = pneg %p1580_p9  ;;  %p1587_p13 = por %p1586_p8, %p1585_p11 }
 0x394   : > { %p1588_p6 = pnand %p1587_p13, %p1581_p0 }
 0x396   : > { %1591 = shalt.err (!%p1588_p6)
}
 0x397   : > { %s1592_s0 = scalar_lea.hbm %s2033_s12, 256  ;;  %s1596_s21 = scalar_lea.hbm %s2157_s8, 512 }
 0x398   : > { %p1593_p10 = scmp.ne.s32.totalorder %s2033_s12, %s1592_s0  ;;  %p1597_p12 = scmp.lt.u32.totalorder %s2033_s12, %s2157_s8 }
 0x399   : > { %p1598_p1 = scmp.lt.u32.totalorder %s1596_s21, %s1592_s0  ;;  %p1600_p4 = scmp.lt.u32.totalorder %s1592_s0, %s2033_s12 }
 0x39a   : > { %p1594_p3 = pnand %p1593_p10, %p1887_p5 }
 0x39b   : > { %p1599_p2 = por %p1598_p1, %p1597_p12 }
 0x39c   : > { %p1595_p7 = pneg %p1594_p3 }
 0x39d   : > { %p1601_p9 = por %p1600_p4, %p1599_p2 }
 0x39f   : > { %p1602_p0 = pnand %p1601_p9, %p1595_p7 }
 0x3a1   : > { %1605 = shalt.err (!%p1602_p0)
}
 0x3a2   : > { %1267 = dma.vmem_to_hbm [thread:$0]  (%p1887_p5), %s2035_s13, 256, %s2033_s12, %s2037_s27, %s2159_s24, %s2159_s24, %s2158_s14  }
 0x3a3 PF: > { %s2160_s28 = sld [smem:[#allocation19_spill]]  ;;  %s2161_s17 = sld [smem:[#allocation20_spill]] }
 0x3a4   : > { %p2163_p8 = scmp.ge.s32.totalorder %s1656_s20, 2 }
 0x3a9   : > { %s974_s22 = sand.u32 1, %s2160_s28   ;;  %p2162_p11 = scmp.ne.s32.totalorder %s2161_s17, 0 }
 0x3aa   : > { %s975_s25 = scalar_lea.sflag [#allocation4], %s974_s22 }
 0x3ab   : > { %p1286_p13 = pnand %p2163_p8, %p2162_p11 }
 0x3ad   : > { %1635 = dma.done.wait (!%p1286_p13), %s975_s25, 256  }
 0x3ae   : > { %1637 = vsyncadd (!%p1286_p13), %s975_s25, 4294967040  ;;  %s2164_s29 = sadd.s32 4294967294, %s1656_s20  }
 0x3af   : > { %s983_s0 = sand.u32 1, %s2164_s29  }
 0x3b0   : > { %s984_s16 = scalar_lea.sflag [#allocation12], %s983_s0 }
 0x3b1   : > { %1639 = dma.done.wait (!%p1286_p13), %s984_s16, 512  }
 0x3b2   : > { %1641 = vsyncadd (!%p1286_p13), %s984_s16, 4294966784  ;;  %p30_p5 = scmp.ge.s32.totalorder %s1873_s11, 4   ;;  %s2165_s17 = smov %s1648_s18 }
 0x3b3   : > { %s2166_s18 = smov %s1652_s19  ;;  %s2167_s19 = smov %s1883_s26 }
 0x3b4   : > { %s2168_s20 = smov %s1873_s11  ;;  %32 = sbr.rel (!%p30_p5) target bundleno = 14 (0xe), region = 145 }
 0x3bb   :  { %998 = vsyncpa [#allocation3], 1 }
 0x3bc   :  { %1000 = vsyncpa [#allocation3 + $0x1], 1 }
 0x3bd   :  { %1001 = vsyncpa [#allocation6], 1 }
 0x3be   :  { %1002 = vsyncpa [#allocation9], 1 }
 0x3bf   :  { %1003 = vsyncpa [#allocation4], 1 }
 0x3c0   :  { %1005 = vsyncpa [#allocation4 + $0x1], 1 }
 0x3c1   :  { %1006 = vsyncpa [#allocation12], 1 }
 0x3c2   :  { %1008 = vsyncpa [#allocation12 + $0x1], 1 }

</bundles_post_ra>
